<compile_context>
chip_gen: v5e
topology: v5e:2x2
jax: 0.10.0
libtpu: 0.0.40
codegen_flags: <defaults>
</compile_context>

<pallas_src>
import functools

import jax
import jax.numpy as jnp
from jax.experimental import pallas as pl
from jax.experimental.pallas import tpu as pltpu


def _round_up(x, m):
    return ((x + m - 1) // m) * m


def mdn_kernel(x_ref, w1_ref, b1_ref, wcat_ref, bcat_ref, out_ref, *, n_gaussian):
    x = x_ref[...]

    # hidden = tanh(Linear1(x)); f32 accumulation on the MXU, tanh on the EUP.
    h = jnp.tanh(
        jnp.dot(x, w1_ref[...], preferred_element_type=jnp.float32) + b1_ref[...]
    )
    # Keep MXU operand dtypes matched (f32 by default, bf16 in bf16-MXU mode).
    h = h.astype(wcat_ref.dtype)

    # One fused head GEMM.  Columns of y:
    #   [0 : G)              -> pi logits
    #   [G : 2G)             -> log(sigma)
    #   [2G : 2G+n_out*G)    -> mu
    #   [2G+n_out*G : pad)   -> zero padding (zero weights/bias -> y == 0)
    y = (
        jnp.dot(h, wcat_ref[...], preferred_element_type=jnp.float32)
        + bcat_ref[...]
    )

    g = n_gaussian
    col = jax.lax.broadcasted_iota(jnp.int32, y.shape, 1)
    is_pi = col < g
    is_sigma = (col >= g) & (col < 2 * g)

    # Numerically-stable softmax over the pi columns only (lane-masked, so the
    # whole row stays in one lane-dense vreg slab; no narrow slices / concats).
    logits = jnp.where(is_pi, y, -jnp.inf)
    m = jnp.max(logits, axis=1, keepdims=True)
    e = jnp.exp(logits - m)  # non-pi lanes -> exp(-inf) = 0
    inv = pl.reciprocal(jnp.sum(e, axis=1, keepdims=True), approx=False)
    pi = e * inv

    sigma = jnp.exp(y)  # only kept on the sigma lanes below

    # Single lane-dense, unmasked full-width store of [pi | sigma | mu | 0-pad].
    out_ref[...] = jnp.where(
        is_pi, pi, jnp.where(is_sigma, sigma, y)
    ).astype(out_ref.dtype)


def _vmem_limit_bytes(b_tile, n_input, n_hidden, padded_out):
    # Double-buffered x / output tiles + resident weights + intermediates,
    # with 2x headroom, clamped to [8 MiB, 32 MiB] (safe on v7x's 64 MiB VMEM).
    f32 = 4
    tiles = 2 * b_tile * n_input + 2 * b_tile * padded_out
    weights = n_input * n_hidden + n_hidden + n_hidden * padded_out + padded_out
    temps = 6 * b_tile * padded_out + 2 * b_tile * n_hidden
    est = f32 * (tiles + weights + temps)
    return int(min(max(2 * est, 8 * 1024 * 1024), 32 * 1024 * 1024))


def mdn_forward(x, params, *, b_tile=None, use_bf16_mxu=False):
    """x: [B, n_input] float32.

    params: dict with (in, out)-layout weights w1/wpi/wsg/wmu and (1, out)
    biases b1/bpi/bsg/bmu (equivalent to the transposed nn.Linear weights).
    Set use_bf16_mxu=True on v6e/v7x to feed bf16 operands to the MXU
    (accumulation and all activations stay f32).
    """
    B, n_input = x.shape
    n_hidden = params["w1"].shape[1]
    n_g = params["wpi"].shape[1]
    n_mu = params["wmu"].shape[1]
    total_out = 2 * n_g + n_mu
    padded_out = _round_up(total_out, 128)

    # Fused + lane-padded head weights. Padding columns are zero so the padded
    # output lanes are exactly zero and get sliced away below.
    wcat = jnp.concatenate([params["wpi"], params["wsg"], params["wmu"]], axis=1)
    bcat = jnp.concatenate([params["bpi"], params["bsg"], params["bmu"]], axis=1)
    wcat = jnp.pad(wcat, ((0, 0), (0, padded_out - total_out)))
    bcat = jnp.pad(bcat, ((0, 0), (0, padded_out - total_out)))

    w1, b1 = params["w1"], params["b1"]
    if use_bf16_mxu:  # v6e / v7x: full-rate bf16 MXU, halves x/weight traffic
        x = x.astype(jnp.bfloat16)
        w1 = w1.astype(jnp.bfloat16)
        wcat = wcat.astype(jnp.bfloat16)

    if b_tile is None:
        b_tile = B if B <= 256 else 256  # multiple of 8 once B is tiled
    grid = (pl.cdiv(B, b_tile),)

    kernel = functools.partial(mdn_kernel, n_gaussian=n_g)
    resident = lambda i: (0, 0)

    out_padded = pl.pallas_call(
        kernel,
        out_shape=jax.ShapeDtypeStruct((B, padded_out), jnp.float32),
        grid=grid,
        in_specs=[
            pl.BlockSpec((b_tile, n_input), lambda i: (i, 0)),      # x tile
            pl.BlockSpec((n_input, n_hidden), resident),            # w1
            pl.BlockSpec((1, n_hidden), resident),                  # b1
            pl.BlockSpec((n_hidden, padded_out), resident),         # wcat
            pl.BlockSpec((1, padded_out), resident),                # bcat
        ],
        out_specs=pl.BlockSpec((b_tile, padded_out), lambda i: (i, 0)),
        compiler_params=pltpu.CompilerParams(
            dimension_semantics=("parallel",),
            vmem_limit_bytes=_vmem_limit_bytes(b_tile, n_input, n_hidden, padded_out),
        ),
    )(x, w1, b1, wcat, bcat)

    pi = out_padded[:, :n_g]
    sigma = out_padded[:, n_g : 2 * n_g]
    mu = out_padded[:, 2 * n_g : total_out]
    return pi, sigma, mu


def init_params(key, n_input, n_hidden, n_output, n_gaussian):
    """Deterministic synthetic init (shapes match nn.Linear layers of MDN)."""
    ks = jax.random.split(key, 8)

    def lin(kw, kb, fan_in, fan_out):
        bound = 1.0 / jnp.sqrt(fan_in)
        w = jax.random.uniform(kw, (fan_in, fan_out), jnp.float32, -bound, bound)
        b = jax.random.uniform(kb, (1, fan_out), jnp.float32, -bound, bound)
        return w, b

    w1, b1 = lin(ks[0], ks[1], n_input, n_hidden)
    wpi, bpi = lin(ks[2], ks[3], n_hidden, n_gaussian)
    wsg, bsg = lin(ks[4], ks[5], n_hidden, n_gaussian)
    wmu, bmu = lin(ks[6], ks[7], n_hidden, n_output * n_gaussian)
    return dict(w1=w1, b1=b1, wpi=wpi, bpi=bpi, wsg=wsg, bsg=bsg, wmu=wmu, bmu=bmu)


def mdn_reference(x, p):
    h = jnp.tanh(x @ p["w1"] + p["b1"])
    pi = jax.nn.softmax(h @ p["wpi"] + p["bpi"], axis=1)
    sigma = jnp.exp(h @ p["wsg"] + p["bsg"])
    mu = h @ p["wmu"] + p["bmu"]
    return pi, sigma, mu


if __name__ == "__main__":
    n_input, n_hidden, n_output, n_gaussian = 8, 32, 2, 4
    batch = 16       # small, but tiled into 2 grid steps below
    b_tile = 8       # exercises the batch grid / pipelining path

    key = jax.random.PRNGKey(0)
    kx, kp = jax.random.split(key)
    x = jax.random.normal(kx, (batch, n_input), dtype=jnp.float32)
    params = init_params(kp, n_input, n_hidden, n_output, n_gaussian)

    pi, sigma, mu = mdn_forward(x, params, b_tile=b_tile, use_bf16_mxu=False)
    jax.block_until_ready((pi, sigma, mu))

    # sanity check against plain-JAX reference
    pi_r, sigma_r, mu_r = mdn_reference(x, params)
    assert jnp.allclose(pi, pi_r, atol=1e-5), "pi mismatch"
    assert jnp.allclose(sigma, sigma_r, atol=1e-4), "sigma mismatch"
    assert jnp.allclose(mu, mu_r, atol=1e-5), "mu mismatch"
    assert jnp.allclose(jnp.sum(pi, axis=1), 1.0, atol=1e-5), "pi rows must sum to 1"
    assert pi.shape == (batch, n_gaussian)
    assert sigma.shape == (batch, n_gaussian)
    assert mu.shape == (batch, n_output * n_gaussian)

    print("KERNEL_OK")
</pallas_src>

<mosaic_0001>
module attributes {stable_mosaic.version = 11 : i64} {
  func.func @mdn_kernel(%arg0: i32, %arg1: memref<8x8xf32, #tpu.memory_space<vmem>>, %arg2: memref<8x32xf32, #tpu.memory_space<vmem>>, %arg3: memref<1x32xf32, #tpu.memory_space<vmem>>, %arg4: memref<32x128xf32, #tpu.memory_space<vmem>>, %arg5: memref<1x128xf32, #tpu.memory_space<vmem>>, %arg6: memref<8x128xf32, #tpu.memory_space<vmem>>) attributes {dimension_semantics = [#tpu.dimension_semantics<parallel>], iteration_bounds = array<i64: 2>, scalar_prefetch = 0 : i64, scratch_operands = 0 : i64, tpu.core_type = #tpu.core_type<tc>, window_params = [{transform_indices = @transform_0, window_bounds = array<i64: 8, 8>}, {pipeline_mode = #tpu.pipeline_mode<synchronous>, transform_indices = @transform_1, window_bounds = array<i64: 8, 32>}, {pipeline_mode = #tpu.pipeline_mode<synchronous>, transform_indices = @transform_2, window_bounds = array<i64: 1, 32>}, {pipeline_mode = #tpu.pipeline_mode<synchronous>, transform_indices = @transform_3, window_bounds = array<i64: 32, 128>}, {pipeline_mode = #tpu.pipeline_mode<synchronous>, transform_indices = @transform_4, window_bounds = array<i64: 1, 128>}, {transform_indices = @transform_5, window_bounds = array<i64: 8, 128>}]} {
    %c0 = arith.constant 0 : index
    %c0_0 = arith.constant 0 : index
    %0 = vector.load %arg1[%c0, %c0_0] : memref<8x8xf32, #tpu.memory_space<vmem>>, vector<8x8xf32>
    %c0_1 = arith.constant 0 : index
    %c0_2 = arith.constant 0 : index
    %1 = vector.load %arg2[%c0_1, %c0_2] : memref<8x32xf32, #tpu.memory_space<vmem>>, vector<8x32xf32>
    %cst = arith.constant dense<0.000000e+00> : vector<8x32xf32>
    %2 = tpu.matmul %0, %1, %cst {dimension_numbers = #tpu.dot_dimension_numbers<[1], [0], [0], [1], [0, 0, 1, 1], [], []>} : vector<8x8xf32>, vector<8x32xf32>, vector<8x32xf32> -> vector<8x32xf32>
    %c0_3 = arith.constant 0 : index
    %c0_4 = arith.constant 0 : index
    %3 = vector.load %arg3[%c0_3, %c0_4] : memref<1x32xf32, #tpu.memory_space<vmem>>, vector<1x32xf32>
    %4 = vector.broadcast %3 : vector<1x32xf32> to vector<8x32xf32>
    %5 = arith.addf %2, %4 : vector<8x32xf32>
    %6 = math.tanh %5 : vector<8x32xf32>
    %c0_5 = arith.constant 0 : index
    %c0_6 = arith.constant 0 : index
    %7 = vector.load %arg4[%c0_5, %c0_6] : memref<32x128xf32, #tpu.memory_space<vmem>>, vector<32x128xf32>
    %cst_7 = arith.constant dense<0.000000e+00> : vector<8x128xf32>
    %8 = tpu.matmul %6, %7, %cst_7 {dimension_numbers = #tpu.dot_dimension_numbers<[1], [0], [0], [1], [0, 0, 1, 1], [], []>} : vector<8x32xf32>, vector<32x128xf32>, vector<8x128xf32> -> vector<8x128xf32>
    %c0_8 = arith.constant 0 : index
    %c0_9 = arith.constant 0 : index
    %9 = vector.load %arg5[%c0_8, %c0_9] : memref<1x128xf32, #tpu.memory_space<vmem>>, vector<1x128xf32>
    %10 = vector.broadcast %9 : vector<1x128xf32> to vector<8x128xf32>
    %11 = arith.addf %8, %10 : vector<8x128xf32>
    %12 = tpu.iota {dimensions = array<i32: 1>} : vector<8x128xi32>
    %c4_i32 = arith.constant 4 : i32
    %13 = vector.broadcast %c4_i32 : i32 to vector<8x128xi32>
    %14 = arith.cmpi slt, %12, %13 : vector<8x128xi32>
    %c4_i32_10 = arith.constant 4 : i32
    %15 = vector.broadcast %c4_i32_10 : i32 to vector<8x128xi32>
    %16 = arith.cmpi sge, %12, %15 : vector<8x128xi32>
    %c8_i32 = arith.constant 8 : i32
    %17 = vector.broadcast %c8_i32 : i32 to vector<8x128xi32>
    %18 = arith.cmpi slt, %12, %17 : vector<8x128xi32>
    %19 = arith.andi %16, %18 : vector<8x128xi1>
    %cst_11 = arith.constant 0xFF800000 : f32
    %20 = vector.broadcast %cst_11 : f32 to vector<8x128xf32>
    %21 = arith.select %14, %11, %20 : vector<8x128xi1>, vector<8x128xf32>
    %cst_12 = arith.constant dense<0xFF800000> : vector<8xf32>
    %22 = vector.multi_reduction <maximumf>, %21, %cst_12 [1] : vector<8x128xf32> to vector<8xf32>
    %23 = vector.shape_cast %22 : vector<8xf32> to vector<8x1xf32>
    %24 = vector.broadcast %23 : vector<8x1xf32> to vector<8x128xf32>
    %25 = arith.subf %21, %24 : vector<8x128xf32>
    %26 = math.exp %25 : vector<8x128xf32>
    %cst_13 = arith.constant dense<0.000000e+00> : vector<8xf32>
    %27 = vector.multi_reduction <add>, %26, %cst_13 [1] : vector<8x128xf32> to vector<8xf32>
    %28 = vector.shape_cast %27 : vector<8xf32> to vector<8x1xf32>
    %29 = tpu.reciprocal %28 : vector<8x1xf32> -> vector<8x1xf32>
    %30 = vector.broadcast %29 : vector<8x1xf32> to vector<8x128xf32>
    %31 = arith.mulf %26, %30 : vector<8x128xf32>
    %32 = math.exp %11 : vector<8x128xf32>
    %33 = arith.select %19, %32, %11 : vector<8x128xi1>, vector<8x128xf32>
    %34 = arith.select %14, %31, %33 : vector<8x128xi1>, vector<8x128xf32>
    %c0_14 = arith.constant 0 : index
    %c0_15 = arith.constant 0 : index
    %35 = vector.load %arg6[%c0_14, %c0_15] : memref<8x128xf32, #tpu.memory_space<vmem>>, vector<8x128xf32>
    tpu.vector_store %arg6[%c0_14, %c0_15], %34 {strides = array<i32>} : memref<8x128xf32, #tpu.memory_space<vmem>>, vector<8x128xf32>,
    return
  }
  func.func @transform_0(%arg0: i32) -> (i32, i32) {
    %c0_i32 = arith.constant 0 : i32
    %c0_i32_0 = arith.constant 0 : i32
    return %arg0, %c0_i32 : i32, i32
  }
  func.func @transform_1(%arg0: i32) -> (i32, i32) {
    %c0_i32 = arith.constant 0 : i32
    %c0_i32_0 = arith.constant 0 : i32
    %c0_i32_1 = arith.constant 0 : i32
    return %c0_i32, %c0_i32_0 : i32, i32
  }
  func.func @transform_2(%arg0: i32) -> (i32, i32) {
    %c0_i32 = arith.constant 0 : i32
    %c0_i32_0 = arith.constant 0 : i32
    %c0_i32_1 = arith.constant 0 : i32
    return %c0_i32, %c0_i32_0 : i32, i32
  }
  func.func @transform_3(%arg0: i32) -> (i32, i32) {
    %c0_i32 = arith.constant 0 : i32
    %c0_i32_0 = arith.constant 0 : i32
    %c0_i32_1 = arith.constant 0 : i32
    return %c0_i32, %c0_i32_0 : i32, i32
  }
  func.func @transform_4(%arg0: i32) -> (i32, i32) {
    %c0_i32 = arith.constant 0 : i32
    %c0_i32_0 = arith.constant 0 : i32
    %c0_i32_1 = arith.constant 0 : i32
    return %c0_i32, %c0_i32_0 : i32, i32
  }
  func.func @transform_5(%arg0: i32) -> (i32, i32) {
    %c0_i32 = arith.constant 0 : i32
    %c0_i32_0 = arith.constant 0 : i32
    return %arg0, %c0_i32 : i32, i32
  }
}

</mosaic_0001>

<bundles_post_ra>
// kernel: tpu_custom_call.1
= control target key start
LH: loop header
LB: loop body
LE: loop exit
PB: predicated region body
PF: predicated region fallthrough
CT: control target
= control target key end

     0   :  { %10 = vsyncpa [#allocation3], 0  ;;  %s740_s0 = inlined_call_operand.vmem [shape: f32[16,8], index: 0, kind: input, shape index: {}]   ;;  %s741_s1 = inlined_call_operand.vmem [shape: f32[8,32], index: 1, kind: input, shape index: {}]   ;;  %s742_s2 = inlined_call_operand.vmem [shape: f32[1,32], index: 2, kind: input, shape index: {}]   ;;  %s743_s3 = inlined_call_operand.hbm [shape: f32[32,128], index: 3, kind: input, shape index: {}]   ;;  %s744_s4 = inlined_call_operand.vmem [shape: f32[1,128], index: 4, kind: input, shape index: {}]   ;;  %s745_s5 = inlined_call_operand.hbm [shape: f32[16,128], index: 5, kind: output, shape index: {}]  }
   0x1   :  { %11 = vsyncpa [#allocation4], 0 }
   0x2   :  { %13 = vsyncpa [#allocation4 + $0x1], 0  ;;  %s628_s18 = smov 0   ;;  %s630_s19 = smov 0  }
   0x3   :  { %s632_s20 = smov 0   ;;  %s634_s21 = smov 0  }
   0x4 LB: > { %s649_s22 = sadd.s32 4294967295, %s593_s21   ;;  %s421_s23 = sadd.s32 4294967294, %s593_s21   ;;  %s593_s21 = sphi %s634_s21, %s753_s21   ;;  %s589_s20 = sphi %s632_s20, %s752_s20   ;;  %s585_s19 = sphi %s630_s19, %s751_s19   ;;  %s581_s18 = sphi %s628_s18, %s750_s18  }
   0x5   : > { %s653_s24 = sadd.s32 1, %s593_s21   ;;  %s136_s25 = sadd.s32 1, %s589_s20 }
   0x6   : > { %s133_s26 = ssub.s32 %s593_s21, %s653_s24  ;;  %p146_p0 = scmp.ne.s32.totalorder %s589_s20, %s585_s19 }
   0x7   : > { %p134_p1 = scmp.eq.s32.totalorder %s133_s26, 0  ;;  %p147_p2 = scmp.eq.s32.totalorder %s649_s22, 1 }
   0x8   : > { %p152_p3 = scmp.ne.s32.totalorder %s585_s19, %s581_s18  ;;  %p153_p4 = scmp.eq.s32.totalorder %s421_s23, 1 }
   0x9   : > { %s664_s27 = scalar_select %p134_p1, %s589_s20, %s136_s25  }
   0xa   : > { %p666_p5 = por %p147_p2, %p146_p0  ;;  %p670_p6 = por %p153_p4, %p152_p3 }
   0xb   : > { %p422_p7 = scmp.ge.s32.totalorder %s593_s21, 1  ;;  %p160_p8 = scmp.lt.s32.totalorder %s593_s21, 3 }
   0xc   : > { %p449_p9 = scmp.eq.s32.totalorder %s649_s22, 0  ;;  %s177_s7 = sshll.u32 %s743_s3, 4  ;;  %s178_s7 = int_to_ptr.hbm [resolvable:$true] %s177_s7 }
   0xd   : > { %p161_p10 = pnand %p422_p7, %p160_p8  ;;  %s595_s8 = smov [#allocation2]  }
   0xe   : > { %s179_s9 = sshll.u32 %s595_s8, 4  ;;  %s596_s10 = smov 128   ;;  %s180_s9 = int_to_ptr.vmem [resolvable:$true] %s179_s9 }
   0xf   : > { %p441_p11 = pneg %p161_p10  ;;  %s597_s11 = smov 8  }
  0x10   : > { %205 = sbr.rel (%p161_p10) target bundleno = 559 (0x22f), region = 40 }
  0x11   : > { %p442_p12 = pnand %p449_p9, %p441_p11 }
  0x13   : > { %444 = dma.hbm_to_vmem [thread:$0]  (!%p442_p12), %s178_s7, 512, %s180_s9, [#allocation3], %s596_s10, %s596_s10, %s597_s11  }
  0x15   : > { %572 = dma.done.wait (%p449_p9), [#allocation3], 512  }
  0x16   : > { %574 = vsyncadd (%p449_p9), [#allocation3], 4294966784  ;;  %p233_p13 = scmp.lt.s32.totalorder %s649_s22, 1  ;;  %vm243_vm0 = vcmask 64512   ;;  %v238_v0 = vld [vmem:[%s741_s1] sm:$0xff]  ;;  %v271_v2 = vld [vmem:[#allocation2 + $0x18] sm:$0xff]  ;;  %v300_v10 = vlaneseq }
  0x17   : > { %262 = vmatpush.msra.mxu0 %v238_v0  ;;  %292 = vmatpush.msra.mxu1 %v271_v2  ;;  %v270_v3 = vld [vmem:[#allocation2 + $0x10] sm:$0xff]  ;;  %v269_v4 = vld [vmem:[#allocation2 + $0x8] sm:$0xff]  ;;  %v268_v5 = vld [vmem:[#allocation2] sm:$0xff]  ;;  %vm276_vm1 = vcmask 261120   ;;  %s230_s7 = sand.u32 1, %s585_s19   ;;  %s432_s9 = sshll.u32 %s649_s22, 3 }
  0x18   : > { %s234_s12 = scalar_select %p233_p13, %s649_s22, 1  ;;  %v487_v6 = vld [vmem:[%s742_s2] ss:$0 sm:$0xff]  ;;  %v301_v11 = vand.u32 127, %v300_v10 }
  0x19   : > { %293 = vmatpush.msra.mxu1 %v270_v3  ;;  %v488_v12 = vld [vmem:[%s744_s4] ss:$0 sm:$0xff]  ;;  %s427_s8 = sshll.u32 %s230_s7, 3  ;;  %s335_s22 = scalar_lea.sflag [#allocation4], %s230_s7 }
  0x1a   : > { %s428_s13 = sshll.u32 %s234_s12, 3  ;;  %vm302_vm2 = vcmp.lt.s32.totalorder %v301_v11, 4  ;;  %vm303_vm3 = vcmp.ge.s32.totalorder %v301_v11, 4  ;;  %vm304_vm4 = vcmp.lt.s32.totalorder %v301_v11, 8  ;;  %s345_s12 = scalar_lea.hbm %s745_s5, %s432_s9 }
  0x1b   : > { %s236_s16 = scalar_lea.vmem %s740_s0, %s428_s13  ;;  %294 = vmatpush.msra.mxu1 %v269_v4  ;;  %vm701_vm5 = vmand %vm303_vm3, %vm304_vm4  ;;  %s232_s13 = scalar_lea.vmem [#allocation5], %s427_s8 }
  0x1c   : > { %v237_v1 = vld [vmem:[%s236_s16] sm:$0xff]  ;;  %s347_s14 = sshll.u32 %s232_s13, 4  ;;  %s349_s15 = sshll.u32 %s345_s12, 4  ;;  %s348_s14 = int_to_ptr.vmem [resolvable:$true] %s347_s14  ;;  %s350_s15 = int_to_ptr.hbm [resolvable:$true] %s349_s15 }
  0x1d   : > { %429 = vmatmul.msk.f32.vlgmr.msra.gmra.mxu0 %vm243_vm0, %v237_v1  ;;  %295 = vmatpush.msra.mxu1 %v268_v5  ;;  %s541_s16 = sshra.s32 %s350_s15, 4  ;;  %s547_s26 = scalar_lea.hbm %s745_s5, 16  ;;  %s542_s16 = int_to_ptr.hbm [resolvable:$true] %s541_s16 }
  0x1e   : > { %s543_s17 = scalar_lea.hbm %s542_s16, 8  ;;  %p548_p3 = scmp.lt.s32.totalorder %s542_s16, %s745_s5 }
  0x1f   : > { %p544_p0 = scmp.ne.s32.totalorder %s542_s16, %s543_s17  ;;  %p549_p4 = scmp.lt.s32.totalorder %s547_s26, %s543_s17 }
  0x21   : > { %p545_p1 = pnand %p544_p0, %p666_p5  ;;  %p550_p7 = por %p549_p4, %p548_p3 }
  0x23   : > { %p546_p2 = pneg %p545_p1 }
  0x25   : > { %p551_p8 = pnand %p550_p7, %p546_p2 }
  0x9a   : > { %v264_v7 = vpop.f32.mrf.mxu0 }
  0x9b   : > { %v265_v8 = vadd.f32 %v487_v6, %v264_v7 }
  0x9d   : > { %489 = vtanh.f32 %v265_v8 }
  0xa3   : > { %v490_v9 = vpop.eup %489 }
  0xa4   : > { %430 = vmatmul.msk.f32.vlgmr.msra.gmra.mxu1 %vm276_vm1, %v490_v9 }
 0x121   : > { %v297_v13 = vpop.f32.mrf.mxu1 }
 0x122   : > { %v298_v14 = vadd.f32 %v488_v12, %v297_v13 }
 0x124   : > { %v329_v15 = vmul.f32 1.442695, %v298_v14  ;;  %v306_v16 = vsel %vm302_vm2, %v298_v14, -inf }
 0x125   : > { %307 = vmax.xlane.f32.xlu0 %v306_v16 }
 0x126   : > { %491 = vpow2.f32 %v329_v15 }
 0x12c   : > { %v492_v18 = vpop.eup %491 }
 0x12d   : > { %v331_v19 = vsel %vm701_vm5, %v492_v18, %v298_v14 }
 0x198   : > { %v308_v20 = vpop.xlane.xlu0 %307 }
 0x199   : > { %v309_v21 = vsub.f32 %v306_v16, %v308_v20 }
 0x19b   : > { %v310_v22 = vmul.f32 1.442695, %v309_v21 }
 0x19d   : > { %493 = vpow2.f32 %v310_v22 }
 0x1a3   : > { %v494_v23 = vpop.eup %493 }
 0x1a4   : > { %312 = vadd.xlane.f32.xlu0 %v494_v23 }
 0x217   : > { %v313_v24 = vpop.xlane.xlu0 %312 }
 0x218   : > { %495 = vrcp.f32 %v313_v24  ;;  %v325_v28 = vand.u32 2147483648, %v313_v24  ;;  %v323_v30 = vand.u32 2147483647, %v313_v24  ;;  %vm319_vm7 = vweird.f32 %v313_v24 }
 0x21a   : > { %v326_v32 = vor.u32 1.1754944e-38, %v325_v28  ;;  %vm324_vm9 = vcmp.eq.f32.partialorder %v323_v30, 8.507059e+37 }
 0x21e   : > { %v496_v25 = vpop.eup %495 }
 0x21f   : > { %v315_v26 = vmul.f32 %v496_v25, %v313_v24  ;;  %vm320_vm6 = vweird.f32 %v496_v25 }
 0x220   : > { %vm321_vm8 = vmor %vm319_vm7, %vm320_vm6 }
 0x221   : > { %v316_v27 = vsub.f32 1.0, %v315_v26 }
 0x223   : > { %v317_v29 = vmul.f32 %v496_v25, %v316_v27 }
 0x225   : > { %v318_v31 = vadd.f32 %v496_v25, %v317_v29 }
 0x227   : > { %v322_v33 = vsel %vm321_vm8, %v496_v25, %v318_v31 }
 0x228   : > { %v327_v34 = vsel %vm324_vm9, %v326_v32, %v322_v33 }
 0x229   : > { %v328_v35 = vmul.f32 %v494_v23, %v327_v34 }
 0x22b   : > { %v332_v36 = vsel %vm302_vm2, %v328_v35, %v331_v19 }
 0x22c   : > { %333 = vst [vmem:[%s232_s13] sm:$0xff] %v332_v36 }
 0x22d   : > { %554 = shalt.err (!%p551_p8)
}
 0x22e   : > { %439 = dma.vmem_to_hbm [thread:$0]  (%p666_p5), %s348_s14, 128, %s350_s15, %s335_s22  }
 0x22f PF: > { %p451_p9 = scmp.ge.s32.totalorder %s593_s21, 2  ;;  %s361_s7 = sand.u32 1, %s581_s18  }
 0x230   : > { %s362_s8 = scalar_lea.sflag [#allocation4], %s361_s7 }
 0x231   : > { %p446_p10 = pnand %p451_p9, %p670_p6 }
 0x233   : > { %p447_p11 = pneg %p446_p10 }
 0x235   : > { %576 = dma.done.wait (%p447_p11), %s362_s8, 128  }
 0x236   : > { %578 = vsyncadd (%p447_p11), %s362_s8, 4294967168  ;;  %p16_p12 = scmp.ge.s32.totalorder %s653_s24, 4   ;;  %s750_s18 = smov %s585_s19 }
 0x237   : > { %s751_s19 = smov %s589_s20  ;;  %s752_s20 = smov %s664_s27 }
 0x238   : > { %s753_s21 = smov %s653_s24  ;;  %18 = sbr.rel (!%p16_p12) target bundleno = 4 (0x4), region = 80 }
 0x23d   :  { %368 = vsyncpa [#allocation3], 1 }
 0x23e   :  { %370 = vsyncpa [#allocation3 + $0x1], 1 }
 0x23f   :  { %371 = vsyncpa [#allocation4], 1 }
 0x240   :  { %373 = vsyncpa [#allocation4 + $0x1], 1 }

</bundles_post_ra>
